<compile_context>
chip_gen: v7x
topology: tpu7x:2x2x1
jax: 0.10.0
libtpu: 0.0.40
codegen_flags: <defaults>
</compile_context>

<pallas_src>
import jax
import jax.numpy as jnp
from jax.experimental import pallas as pl
from jax.experimental.pallas import tpu as pltpu

THRESHOLD = 1.0


def _snn_kernel(x_ref, w1_ref, b1_ref, w2_ref, b2_ref, mem_slab_ref,
                *, beta, num_steps, dout):
    """Whole SNN rollout in one invocation; membrane state lives in vregs."""
    # ---- fc1 is time-invariant (same x every step): compute once ----
    cur1 = jnp.dot(x_ref[...], w1_ref[...],
                   preferred_element_type=jnp.float32) + b1_ref[...]   # (B, H)
    B = cur1.shape[0]

    # ---- Phase 1: layer-0 LIF rollout (VPU only), collect all spike maps ----
    mem0 = jnp.zeros_like(cur1)                 # (B, H)
    spk_steps = []
    for _ in range(num_steps):
        # subtract-reset uses mem_prev; spike uses mem_new
        mem0 = beta * mem0 + cur1 - jnp.where(mem0 > THRESHOLD, THRESHOLD, 0.0)
        spk_steps.append(jnp.where(mem0 > THRESHOLD, 1.0, 0.0))
    spk_all = jnp.concatenate(spk_steps, axis=0)          # (num_steps*B, H)

    # ---- Phase 2: one MXU pass for every step's fc2 ----
    cur2_all = jnp.dot(spk_all, w2_ref[...],
                       preferred_element_type=jnp.float32) + b2_ref[...]   # (num_steps*B, Dout)

    # ---- Phase 3: layer-1 LIF rollout (VPU only), lane-dense slab store ----
    mem1 = jnp.zeros((B, dout), jnp.float32)    # (B, Dout)
    mem_steps = []
    for t in range(num_steps):
        cur2 = cur2_all[t * B:(t + 1) * B, :]   # static, sublane-aligned slice
        mem1 = beta * mem1 + cur2 - jnp.where(mem1 > THRESHOLD, THRESHOLD, 0.0)
        mem_steps.append(mem1)

    # Single lane-dense store: (B, num_steps*Dout) slab (one full 8x128 vreg at
    # the test shapes). spk_rec is recovered in the wrapper.
    mem_slab_ref[...] = jnp.concatenate(mem_steps, axis=1)


def snn_all_at_once(x, w1, b1, w2, b2, *, num_steps=8, beta=0.95):
    B, Din = x.shape
    H = w1.shape[1]
    Dout = w2.shape[1]
    b1_2d = b1.reshape(1, H)
    b2_2d = b2.reshape(1, Dout)

    kernel = lambda *refs: _snn_kernel(*refs, beta=beta,
                                       num_steps=num_steps, dout=Dout)

    mem_slab = pl.pallas_call(
        kernel,
        out_shape=jax.ShapeDtypeStruct((B, num_steps * Dout), jnp.float32),
        grid_spec=pltpu.PrefetchScalarGridSpec(
            num_scalar_prefetch=0,
            grid=(1,),                                   # single invocation
            in_specs=[
                pl.BlockSpec((B, Din), lambda i: (0, 0)),
                pl.BlockSpec((Din, H), lambda i: (0, 0)),
                pl.BlockSpec((1, H), lambda i: (0, 0)),
                pl.BlockSpec((H, Dout), lambda i: (0, 0)),
                pl.BlockSpec((1, Dout), lambda i: (0, 0)),
            ],
            out_specs=pl.BlockSpec((B, num_steps * Dout), lambda i: (0, 0)),
        ),
        compiler_params=pltpu.CompilerParams(
            dimension_semantics=("arbitrary",),
        ),
    )(x, w1, b1_2d, w2, b2_2d)

    # mem_rec[t, b, :] = membrane of the last layer at step t.
    mem_rec = mem_slab.reshape(B, num_steps, Dout).transpose(1, 0, 2)
    # With subtract-reset, spk of the last layer is a pure function of mem_new:
    spk_rec = (mem_rec - THRESHOLD > 0.0).astype(jnp.float32)
    return spk_rec, mem_rec


def snn_reference(x, w1, b1, w2, b2, *, num_steps=8, beta=0.95):
    """Pure-JAX reference matching the PyTorch/snntorch semantics."""
    B = x.shape[0]
    H = w1.shape[1]
    Dout = w2.shape[1]
    mem0 = jnp.zeros((B, H), jnp.float32)
    mem1 = jnp.zeros((B, Dout), jnp.float32)
    spk_rec, mem_rec = [], []
    for _ in range(num_steps):
        cur1 = x @ w1 + b1
        reset0 = (mem0 - THRESHOLD > 0).astype(jnp.float32)
        mem0 = beta * mem0 + cur1 - reset0 * THRESHOLD
        spk0 = (mem0 - THRESHOLD > 0).astype(jnp.float32)
        cur2 = spk0 @ w2 + b2
        reset1 = (mem1 - THRESHOLD > 0).astype(jnp.float32)
        mem1 = beta * mem1 + cur2 - reset1 * THRESHOLD
        spk1 = (mem1 - THRESHOLD > 0).astype(jnp.float32)
        spk_rec.append(spk1)
        mem_rec.append(mem1)
    return jnp.stack(spk_rec, 0), jnp.stack(mem_rec, 0)


if __name__ == "__main__":
    B, Din, H, Dout = 8, 32, 64, 16
    num_steps, beta = 8, 0.95

    key = jax.random.PRNGKey(0)
    kx, k1, k2, k3, k4 = jax.random.split(key, 5)
    x = jax.random.normal(kx, (B, Din), jnp.float32)
    # Deterministic "Linear" parameters (PyTorch-style uniform fan-in scaling).
    w1 = jax.random.uniform(k1, (Din, H), jnp.float32, -1.0, 1.0) / jnp.sqrt(Din)
    b1 = jax.random.uniform(k2, (H,), jnp.float32, -1.0, 1.0) / jnp.sqrt(Din)
    w2 = jax.random.uniform(k3, (H, Dout), jnp.float32, -1.0, 1.0) / jnp.sqrt(H)
    b2 = jax.random.uniform(k4, (Dout,), jnp.float32, -1.0, 1.0) / jnp.sqrt(H)

    spk_rec, mem_rec = snn_all_at_once(x, w1, b1, w2, b2,
                                       num_steps=num_steps, beta=beta)
    jax.block_until_ready((spk_rec, mem_rec))

    spk_ref, mem_ref = snn_reference(x, w1, b1, w2, b2,
                                     num_steps=num_steps, beta=beta)
    assert spk_rec.shape == (num_steps, B, Dout)
    assert mem_rec.shape == (num_steps, B, Dout)
    assert jnp.allclose(spk_rec, spk_ref, atol=1e-5)
    assert jnp.allclose(mem_rec, mem_ref, atol=1e-5)

    print("KERNEL_OK")
</pallas_src>

<mosaic_0001>
module attributes {stable_mosaic.version = 11 : i64} {
  func.func @_lambda_(%arg0: i32, %arg1: memref<8x32xf32, #tpu.memory_space<vmem>>, %arg2: memref<32x64xf32, #tpu.memory_space<vmem>>, %arg3: memref<1x64xf32, #tpu.memory_space<vmem>>, %arg4: memref<64x16xf32, #tpu.memory_space<vmem>>, %arg5: memref<1x16xf32, #tpu.memory_space<vmem>>, %arg6: memref<8x128xf32, #tpu.memory_space<vmem>>) attributes {dimension_semantics = [#tpu.dimension_semantics<arbitrary>], iteration_bounds = array<i64: 1>, scalar_prefetch = 0 : i64, scratch_operands = 0 : i64, tpu.core_type = #tpu.core_type<tc>, window_params = [{pipeline_mode = #tpu.pipeline_mode<synchronous>, transform_indices = @transform_0, window_bounds = array<i64: 8, 32>}, {pipeline_mode = #tpu.pipeline_mode<synchronous>, transform_indices = @transform_1, window_bounds = array<i64: 32, 64>}, {pipeline_mode = #tpu.pipeline_mode<synchronous>, transform_indices = @transform_2, window_bounds = array<i64: 1, 64>}, {pipeline_mode = #tpu.pipeline_mode<synchronous>, transform_indices = @transform_3, window_bounds = array<i64: 64, 16>}, {pipeline_mode = #tpu.pipeline_mode<synchronous>, transform_indices = @transform_4, window_bounds = array<i64: 1, 16>}, {pipeline_mode = #tpu.pipeline_mode<synchronous>, transform_indices = @transform_5, window_bounds = array<i64: 8, 128>}]} {
    %c0 = arith.constant 0 : index
    %c0_0 = arith.constant 0 : index
    %0 = vector.load %arg1[%c0, %c0_0] : memref<8x32xf32, #tpu.memory_space<vmem>>, vector<8x32xf32>
    %c0_1 = arith.constant 0 : index
    %c0_2 = arith.constant 0 : index
    %1 = vector.load %arg2[%c0_1, %c0_2] : memref<32x64xf32, #tpu.memory_space<vmem>>, vector<32x64xf32>
    %cst = arith.constant dense<0.000000e+00> : vector<8x64xf32>
    %2 = tpu.matmul %0, %1, %cst {dimension_numbers = #tpu.dot_dimension_numbers<[1], [0], [0], [1], [0, 0, 1, 1], [], []>} : vector<8x32xf32>, vector<32x64xf32>, vector<8x64xf32> -> vector<8x64xf32>
    %c0_3 = arith.constant 0 : index
    %c0_4 = arith.constant 0 : index
    %3 = vector.load %arg3[%c0_3, %c0_4] : memref<1x64xf32, #tpu.memory_space<vmem>>, vector<1x64xf32>
    %4 = vector.broadcast %3 : vector<1x64xf32> to vector<8x64xf32>
    %5 = arith.addf %2, %4 : vector<8x64xf32>
    %cst_5 = arith.constant 0.000000e+00 : f32
    %6 = vector.broadcast %cst_5 : f32 to vector<8x64xf32>
    %cst_6 = arith.constant 0.949999988 : f32
    %7 = vector.broadcast %cst_6 : f32 to vector<8x64xf32>
    %8 = arith.mulf %7, %6 : vector<8x64xf32>
    %9 = arith.addf %8, %5 : vector<8x64xf32>
    %cst_7 = arith.constant 1.000000e+00 : f32
    %10 = vector.broadcast %cst_7 : f32 to vector<8x64xf32>
    %11 = arith.cmpf ogt, %6, %10 : vector<8x64xf32>
    %cst_8 = arith.constant 1.000000e+00 : f32
    %cst_9 = arith.constant 0.000000e+00 : f32
    %12 = vector.broadcast %cst_8 : f32 to vector<8x64xf32>
    %13 = vector.broadcast %cst_9 : f32 to vector<8x64xf32>
    %14 = arith.select %11, %12, %13 : vector<8x64xi1>, vector<8x64xf32>
    %15 = arith.subf %9, %14 : vector<8x64xf32>
    %cst_10 = arith.constant 1.000000e+00 : f32
    %16 = vector.broadcast %cst_10 : f32 to vector<8x64xf32>
    %17 = arith.cmpf ogt, %15, %16 : vector<8x64xf32>
    %cst_11 = arith.constant 1.000000e+00 : f32
    %cst_12 = arith.constant 0.000000e+00 : f32
    %18 = vector.broadcast %cst_11 : f32 to vector<8x64xf32>
    %19 = vector.broadcast %cst_12 : f32 to vector<8x64xf32>
    %20 = arith.select %17, %18, %19 : vector<8x64xi1>, vector<8x64xf32>
    %cst_13 = arith.constant 0.949999988 : f32
    %21 = vector.broadcast %cst_13 : f32 to vector<8x64xf32>
    %22 = arith.mulf %21, %15 : vector<8x64xf32>
    %23 = arith.addf %22, %5 : vector<8x64xf32>
    %cst_14 = arith.constant 1.000000e+00 : f32
    %24 = vector.broadcast %cst_14 : f32 to vector<8x64xf32>
    %25 = arith.cmpf ogt, %15, %24 : vector<8x64xf32>
    %cst_15 = arith.constant 1.000000e+00 : f32
    %cst_16 = arith.constant 0.000000e+00 : f32
    %26 = vector.broadcast %cst_15 : f32 to vector<8x64xf32>
    %27 = vector.broadcast %cst_16 : f32 to vector<8x64xf32>
    %28 = arith.select %25, %26, %27 : vector<8x64xi1>, vector<8x64xf32>
    %29 = arith.subf %23, %28 : vector<8x64xf32>
    %cst_17 = arith.constant 1.000000e+00 : f32
    %30 = vector.broadcast %cst_17 : f32 to vector<8x64xf32>
    %31 = arith.cmpf ogt, %29, %30 : vector<8x64xf32>
    %cst_18 = arith.constant 1.000000e+00 : f32
    %cst_19 = arith.constant 0.000000e+00 : f32
    %32 = vector.broadcast %cst_18 : f32 to vector<8x64xf32>
    %33 = vector.broadcast %cst_19 : f32 to vector<8x64xf32>
    %34 = arith.select %31, %32, %33 : vector<8x64xi1>, vector<8x64xf32>
    %cst_20 = arith.constant 0.949999988 : f32
    %35 = vector.broadcast %cst_20 : f32 to vector<8x64xf32>
    %36 = arith.mulf %35, %29 : vector<8x64xf32>
    %37 = arith.addf %36, %5 : vector<8x64xf32>
    %cst_21 = arith.constant 1.000000e+00 : f32
    %38 = vector.broadcast %cst_21 : f32 to vector<8x64xf32>
    %39 = arith.cmpf ogt, %29, %38 : vector<8x64xf32>
    %cst_22 = arith.constant 1.000000e+00 : f32
    %cst_23 = arith.constant 0.000000e+00 : f32
    %40 = vector.broadcast %cst_22 : f32 to vector<8x64xf32>
    %41 = vector.broadcast %cst_23 : f32 to vector<8x64xf32>
    %42 = arith.select %39, %40, %41 : vector<8x64xi1>, vector<8x64xf32>
    %43 = arith.subf %37, %42 : vector<8x64xf32>
    %cst_24 = arith.constant 1.000000e+00 : f32
    %44 = vector.broadcast %cst_24 : f32 to vector<8x64xf32>
    %45 = arith.cmpf ogt, %43, %44 : vector<8x64xf32>
    %cst_25 = arith.constant 1.000000e+00 : f32
    %cst_26 = arith.constant 0.000000e+00 : f32
    %46 = vector.broadcast %cst_25 : f32 to vector<8x64xf32>
    %47 = vector.broadcast %cst_26 : f32 to vector<8x64xf32>
    %48 = arith.select %45, %46, %47 : vector<8x64xi1>, vector<8x64xf32>
    %cst_27 = arith.constant 0.949999988 : f32
    %49 = vector.broadcast %cst_27 : f32 to vector<8x64xf32>
    %50 = arith.mulf %49, %43 : vector<8x64xf32>
    %51 = arith.addf %50, %5 : vector<8x64xf32>
    %cst_28 = arith.constant 1.000000e+00 : f32
    %52 = vector.broadcast %cst_28 : f32 to vector<8x64xf32>
    %53 = arith.cmpf ogt, %43, %52 : vector<8x64xf32>
    %cst_29 = arith.constant 1.000000e+00 : f32
    %cst_30 = arith.constant 0.000000e+00 : f32
    %54 = vector.broadcast %cst_29 : f32 to vector<8x64xf32>
    %55 = vector.broadcast %cst_30 : f32 to vector<8x64xf32>
    %56 = arith.select %53, %54, %55 : vector<8x64xi1>, vector<8x64xf32>
    %57 = arith.subf %51, %56 : vector<8x64xf32>
    %cst_31 = arith.constant 1.000000e+00 : f32
    %58 = vector.broadcast %cst_31 : f32 to vector<8x64xf32>
    %59 = arith.cmpf ogt, %57, %58 : vector<8x64xf32>
    %cst_32 = arith.constant 1.000000e+00 : f32
    %cst_33 = arith.constant 0.000000e+00 : f32
    %60 = vector.broadcast %cst_32 : f32 to vector<8x64xf32>
    %61 = vector.broadcast %cst_33 : f32 to vector<8x64xf32>
    %62 = arith.select %59, %60, %61 : vector<8x64xi1>, vector<8x64xf32>
    %cst_34 = arith.constant 0.949999988 : f32
    %63 = vector.broadcast %cst_34 : f32 to vector<8x64xf32>
    %64 = arith.mulf %63, %57 : vector<8x64xf32>
    %65 = arith.addf %64, %5 : vector<8x64xf32>
    %cst_35 = arith.constant 1.000000e+00 : f32
    %66 = vector.broadcast %cst_35 : f32 to vector<8x64xf32>
    %67 = arith.cmpf ogt, %57, %66 : vector<8x64xf32>
    %cst_36 = arith.constant 1.000000e+00 : f32
    %cst_37 = arith.constant 0.000000e+00 : f32
    %68 = vector.broadcast %cst_36 : f32 to vector<8x64xf32>
    %69 = vector.broadcast %cst_37 : f32 to vector<8x64xf32>
    %70 = arith.select %67, %68, %69 : vector<8x64xi1>, vector<8x64xf32>
    %71 = arith.subf %65, %70 : vector<8x64xf32>
    %cst_38 = arith.constant 1.000000e+00 : f32
    %72 = vector.broadcast %cst_38 : f32 to vector<8x64xf32>
    %73 = arith.cmpf ogt, %71, %72 : vector<8x64xf32>
    %cst_39 = arith.constant 1.000000e+00 : f32
    %cst_40 = arith.constant 0.000000e+00 : f32
    %74 = vector.broadcast %cst_39 : f32 to vector<8x64xf32>
    %75 = vector.broadcast %cst_40 : f32 to vector<8x64xf32>
    %76 = arith.select %73, %74, %75 : vector<8x64xi1>, vector<8x64xf32>
    %cst_41 = arith.constant 0.949999988 : f32
    %77 = vector.broadcast %cst_41 : f32 to vector<8x64xf32>
    %78 = arith.mulf %77, %71 : vector<8x64xf32>
    %79 = arith.addf %78, %5 : vector<8x64xf32>
    %cst_42 = arith.constant 1.000000e+00 : f32
    %80 = vector.broadcast %cst_42 : f32 to vector<8x64xf32>
    %81 = arith.cmpf ogt, %71, %80 : vector<8x64xf32>
    %cst_43 = arith.constant 1.000000e+00 : f32
    %cst_44 = arith.constant 0.000000e+00 : f32
    %82 = vector.broadcast %cst_43 : f32 to vector<8x64xf32>
    %83 = vector.broadcast %cst_44 : f32 to vector<8x64xf32>
    %84 = arith.select %81, %82, %83 : vector<8x64xi1>, vector<8x64xf32>
    %85 = arith.subf %79, %84 : vector<8x64xf32>
    %cst_45 = arith.constant 1.000000e+00 : f32
    %86 = vector.broadcast %cst_45 : f32 to vector<8x64xf32>
    %87 = arith.cmpf ogt, %85, %86 : vector<8x64xf32>
    %cst_46 = arith.constant 1.000000e+00 : f32
    %cst_47 = arith.constant 0.000000e+00 : f32
    %88 = vector.broadcast %cst_46 : f32 to vector<8x64xf32>
    %89 = vector.broadcast %cst_47 : f32 to vector<8x64xf32>
    %90 = arith.select %87, %88, %89 : vector<8x64xi1>, vector<8x64xf32>
    %cst_48 = arith.constant 0.949999988 : f32
    %91 = vector.broadcast %cst_48 : f32 to vector<8x64xf32>
    %92 = arith.mulf %91, %85 : vector<8x64xf32>
    %93 = arith.addf %92, %5 : vector<8x64xf32>
    %cst_49 = arith.constant 1.000000e+00 : f32
    %94 = vector.broadcast %cst_49 : f32 to vector<8x64xf32>
    %95 = arith.cmpf ogt, %85, %94 : vector<8x64xf32>
    %cst_50 = arith.constant 1.000000e+00 : f32
    %cst_51 = arith.constant 0.000000e+00 : f32
    %96 = vector.broadcast %cst_50 : f32 to vector<8x64xf32>
    %97 = vector.broadcast %cst_51 : f32 to vector<8x64xf32>
    %98 = arith.select %95, %96, %97 : vector<8x64xi1>, vector<8x64xf32>
    %99 = arith.subf %93, %98 : vector<8x64xf32>
    %cst_52 = arith.constant 1.000000e+00 : f32
    %100 = vector.broadcast %cst_52 : f32 to vector<8x64xf32>
    %101 = arith.cmpf ogt, %99, %100 : vector<8x64xf32>
    %cst_53 = arith.constant 1.000000e+00 : f32
    %cst_54 = arith.constant 0.000000e+00 : f32
    %102 = vector.broadcast %cst_53 : f32 to vector<8x64xf32>
    %103 = vector.broadcast %cst_54 : f32 to vector<8x64xf32>
    %104 = arith.select %101, %102, %103 : vector<8x64xi1>, vector<8x64xf32>
    %cst_55 = arith.constant 0.949999988 : f32
    %105 = vector.broadcast %cst_55 : f32 to vector<8x64xf32>
    %106 = arith.mulf %105, %99 : vector<8x64xf32>
    %107 = arith.addf %106, %5 : vector<8x64xf32>
    %cst_56 = arith.constant 1.000000e+00 : f32
    %108 = vector.broadcast %cst_56 : f32 to vector<8x64xf32>
    %109 = arith.cmpf ogt, %99, %108 : vector<8x64xf32>
    %cst_57 = arith.constant 1.000000e+00 : f32
    %cst_58 = arith.constant 0.000000e+00 : f32
    %110 = vector.broadcast %cst_57 : f32 to vector<8x64xf32>
    %111 = vector.broadcast %cst_58 : f32 to vector<8x64xf32>
    %112 = arith.select %109, %110, %111 : vector<8x64xi1>, vector<8x64xf32>
    %113 = arith.subf %107, %112 : vector<8x64xf32>
    %cst_59 = arith.constant 1.000000e+00 : f32
    %114 = vector.broadcast %cst_59 : f32 to vector<8x64xf32>
    %115 = arith.cmpf ogt, %113, %114 : vector<8x64xf32>
    %cst_60 = arith.constant 1.000000e+00 : f32
    %cst_61 = arith.constant 0.000000e+00 : f32
    %116 = vector.broadcast %cst_60 : f32 to vector<8x64xf32>
    %117 = vector.broadcast %cst_61 : f32 to vector<8x64xf32>
    %118 = arith.select %115, %116, %117 : vector<8x64xi1>, vector<8x64xf32>
    %119 = tpu.concatenate %20, %34, %48, %62, %76, %90, %104, %118 in 0 : vector<8x64xf32>, vector<8x64xf32>, vector<8x64xf32>, vector<8x64xf32>, vector<8x64xf32>, vector<8x64xf32>, vector<8x64xf32>, vector<8x64xf32> -> vector<64x64xf32>
    %c0_62 = arith.constant 0 : index
    %c0_63 = arith.constant 0 : index
    %120 = vector.load %arg4[%c0_62, %c0_63] : memref<64x16xf32, #tpu.memory_space<vmem>>, vector<64x16xf32>
    %cst_64 = arith.constant dense<0.000000e+00> : vector<64x16xf32>
    %121 = tpu.matmul %119, %120, %cst_64 {dimension_numbers = #tpu.dot_dimension_numbers<[1], [0], [0], [1], [0, 0, 1, 1], [], []>} : vector<64x64xf32>, vector<64x16xf32>, vector<64x16xf32> -> vector<64x16xf32>
    %c0_65 = arith.constant 0 : index
    %c0_66 = arith.constant 0 : index
    %122 = vector.load %arg5[%c0_65, %c0_66] : memref<1x16xf32, #tpu.memory_space<vmem>>, vector<1x16xf32>
    %123 = vector.broadcast %122 : vector<1x16xf32> to vector<64x16xf32>
    %124 = arith.addf %121, %123 : vector<64x16xf32>
    %cst_67 = arith.constant 0.000000e+00 : f32
    %125 = vector.broadcast %cst_67 : f32 to vector<8x16xf32>
    %126 = vector.extract_strided_slice %124 {offsets = [0, 0], sizes = [8, 16], strides = [1, 1]} : vector<64x16xf32> to vector<8x16xf32>
    %cst_68 = arith.constant 0.949999988 : f32
    %127 = vector.broadcast %cst_68 : f32 to vector<8x16xf32>
    %128 = arith.mulf %127, %125 : vector<8x16xf32>
    %129 = arith.addf %128, %126 : vector<8x16xf32>
    %cst_69 = arith.constant 1.000000e+00 : f32
    %130 = vector.broadcast %cst_69 : f32 to vector<8x16xf32>
    %131 = arith.cmpf ogt, %125, %130 : vector<8x16xf32>
    %cst_70 = arith.constant 1.000000e+00 : f32
    %cst_71 = arith.constant 0.000000e+00 : f32
    %132 = vector.broadcast %cst_70 : f32 to vector<8x16xf32>
    %133 = vector.broadcast %cst_71 : f32 to vector<8x16xf32>
    %134 = arith.select %131, %132, %133 : vector<8x16xi1>, vector<8x16xf32>
    %135 = arith.subf %129, %134 : vector<8x16xf32>
    %136 = vector.extract_strided_slice %124 {offsets = [8, 0], sizes = [8, 16], strides = [1, 1]} : vector<64x16xf32> to vector<8x16xf32>
    %cst_72 = arith.constant 0.949999988 : f32
    %137 = vector.broadcast %cst_72 : f32 to vector<8x16xf32>
    %138 = arith.mulf %137, %135 : vector<8x16xf32>
    %139 = arith.addf %138, %136 : vector<8x16xf32>
    %cst_73 = arith.constant 1.000000e+00 : f32
    %140 = vector.broadcast %cst_73 : f32 to vector<8x16xf32>
    %141 = arith.cmpf ogt, %135, %140 : vector<8x16xf32>
    %cst_74 = arith.constant 1.000000e+00 : f32
    %cst_75 = arith.constant 0.000000e+00 : f32
    %142 = vector.broadcast %cst_74 : f32 to vector<8x16xf32>
    %143 = vector.broadcast %cst_75 : f32 to vector<8x16xf32>
    %144 = arith.select %141, %142, %143 : vector<8x16xi1>, vector<8x16xf32>
    %145 = arith.subf %139, %144 : vector<8x16xf32>
    %146 = vector.extract_strided_slice %124 {offsets = [16, 0], sizes = [8, 16], strides = [1, 1]} : vector<64x16xf32> to vector<8x16xf32>
    %cst_76 = arith.constant 0.949999988 : f32
    %147 = vector.broadcast %cst_76 : f32 to vector<8x16xf32>
    %148 = arith.mulf %147, %145 : vector<8x16xf32>
    %149 = arith.addf %148, %146 : vector<8x16xf32>
    %cst_77 = arith.constant 1.000000e+00 : f32
    %150 = vector.broadcast %cst_77 : f32 to vector<8x16xf32>
    %151 = arith.cmpf ogt, %145, %150 : vector<8x16xf32>
    %cst_78 = arith.constant 1.000000e+00 : f32
    %cst_79 = arith.constant 0.000000e+00 : f32
    %152 = vector.broadcast %cst_78 : f32 to vector<8x16xf32>
    %153 = vector.broadcast %cst_79 : f32 to vector<8x16xf32>
    %154 = arith.select %151, %152, %153 : vector<8x16xi1>, vector<8x16xf32>
    %155 = arith.subf %149, %154 : vector<8x16xf32>
    %156 = vector.extract_strided_slice %124 {offsets = [24, 0], sizes = [8, 16], strides = [1, 1]} : vector<64x16xf32> to vector<8x16xf32>
    %cst_80 = arith.constant 0.949999988 : f32
    %157 = vector.broadcast %cst_80 : f32 to vector<8x16xf32>
    %158 = arith.mulf %157, %155 : vector<8x16xf32>
    %159 = arith.addf %158, %156 : vector<8x16xf32>
    %cst_81 = arith.constant 1.000000e+00 : f32
    %160 = vector.broadcast %cst_81 : f32 to vector<8x16xf32>
    %161 = arith.cmpf ogt, %155, %160 : vector<8x16xf32>
    %cst_82 = arith.constant 1.000000e+00 : f32
    %cst_83 = arith.constant 0.000000e+00 : f32
    %162 = vector.broadcast %cst_82 : f32 to vector<8x16xf32>
    %163 = vector.broadcast %cst_83 : f32 to vector<8x16xf32>
    %164 = arith.select %161, %162, %163 : vector<8x16xi1>, vector<8x16xf32>
    %165 = arith.subf %159, %164 : vector<8x16xf32>
    %166 = vector.extract_strided_slice %124 {offsets = [32, 0], sizes = [8, 16], strides = [1, 1]} : vector<64x16xf32> to vector<8x16xf32>
    %cst_84 = arith.constant 0.949999988 : f32
    %167 = vector.broadcast %cst_84 : f32 to vector<8x16xf32>
    %168 = arith.mulf %167, %165 : vector<8x16xf32>
    %169 = arith.addf %168, %166 : vector<8x16xf32>
    %cst_85 = arith.constant 1.000000e+00 : f32
    %170 = vector.broadcast %cst_85 : f32 to vector<8x16xf32>
    %171 = arith.cmpf ogt, %165, %170 : vector<8x16xf32>
    %cst_86 = arith.constant 1.000000e+00 : f32
    %cst_87 = arith.constant 0.000000e+00 : f32
    %172 = vector.broadcast %cst_86 : f32 to vector<8x16xf32>
    %173 = vector.broadcast %cst_87 : f32 to vector<8x16xf32>
    %174 = arith.select %171, %172, %173 : vector<8x16xi1>, vector<8x16xf32>
    %175 = arith.subf %169, %174 : vector<8x16xf32>
    %176 = vector.extract_strided_slice %124 {offsets = [40, 0], sizes = [8, 16], strides = [1, 1]} : vector<64x16xf32> to vector<8x16xf32>
    %cst_88 = arith.constant 0.949999988 : f32
    %177 = vector.broadcast %cst_88 : f32 to vector<8x16xf32>
    %178 = arith.mulf %177, %175 : vector<8x16xf32>
    %179 = arith.addf %178, %176 : vector<8x16xf32>
    %cst_89 = arith.constant 1.000000e+00 : f32
    %180 = vector.broadcast %cst_89 : f32 to vector<8x16xf32>
    %181 = arith.cmpf ogt, %175, %180 : vector<8x16xf32>
    %cst_90 = arith.constant 1.000000e+00 : f32
    %cst_91 = arith.constant 0.000000e+00 : f32
    %182 = vector.broadcast %cst_90 : f32 to vector<8x16xf32>
    %183 = vector.broadcast %cst_91 : f32 to vector<8x16xf32>
    %184 = arith.select %181, %182, %183 : vector<8x16xi1>, vector<8x16xf32>
    %185 = arith.subf %179, %184 : vector<8x16xf32>
    %186 = vector.extract_strided_slice %124 {offsets = [48, 0], sizes = [8, 16], strides = [1, 1]} : vector<64x16xf32> to vector<8x16xf32>
    %cst_92 = arith.constant 0.949999988 : f32
    %187 = vector.broadcast %cst_92 : f32 to vector<8x16xf32>
    %188 = arith.mulf %187, %185 : vector<8x16xf32>
    %189 = arith.addf %188, %186 : vector<8x16xf32>
    %cst_93 = arith.constant 1.000000e+00 : f32
    %190 = vector.broadcast %cst_93 : f32 to vector<8x16xf32>
    %191 = arith.cmpf ogt, %185, %190 : vector<8x16xf32>
    %cst_94 = arith.constant 1.000000e+00 : f32
    %cst_95 = arith.constant 0.000000e+00 : f32
    %192 = vector.broadcast %cst_94 : f32 to vector<8x16xf32>
    %193 = vector.broadcast %cst_95 : f32 to vector<8x16xf32>
    %194 = arith.select %191, %192, %193 : vector<8x16xi1>, vector<8x16xf32>
    %195 = arith.subf %189, %194 : vector<8x16xf32>
    %196 = vector.extract_strided_slice %124 {offsets = [56, 0], sizes = [8, 16], strides = [1, 1]} : vector<64x16xf32> to vector<8x16xf32>
    %cst_96 = arith.constant 0.949999988 : f32
    %197 = vector.broadcast %cst_96 : f32 to vector<8x16xf32>
    %198 = arith.mulf %197, %195 : vector<8x16xf32>
    %199 = arith.addf %198, %196 : vector<8x16xf32>
    %cst_97 = arith.constant 1.000000e+00 : f32
    %200 = vector.broadcast %cst_97 : f32 to vector<8x16xf32>
    %201 = arith.cmpf ogt, %195, %200 : vector<8x16xf32>
    %cst_98 = arith.constant 1.000000e+00 : f32
    %cst_99 = arith.constant 0.000000e+00 : f32
    %202 = vector.broadcast %cst_98 : f32 to vector<8x16xf32>
    %203 = vector.broadcast %cst_99 : f32 to vector<8x16xf32>
    %204 = arith.select %201, %202, %203 : vector<8x16xi1>, vector<8x16xf32>
    %205 = arith.subf %199, %204 : vector<8x16xf32>
    %206 = tpu.concatenate %135, %145, %155, %165, %175, %185, %195, %205 in 1 : vector<8x16xf32>, vector<8x16xf32>, vector<8x16xf32>, vector<8x16xf32>, vector<8x16xf32>, vector<8x16xf32>, vector<8x16xf32>, vector<8x16xf32> -> vector<8x128xf32>
    %c0_100 = arith.constant 0 : index
    %c0_101 = arith.constant 0 : index
    %207 = vector.load %arg6[%c0_100, %c0_101] : memref<8x128xf32, #tpu.memory_space<vmem>>, vector<8x128xf32>
    tpu.vector_store %arg6[%c0_100, %c0_101], %206 {strides = array<i32>} : memref<8x128xf32, #tpu.memory_space<vmem>>, vector<8x128xf32>,
    return
  }
  func.func @transform_0(%arg0: i32) -> (i32, i32) {
    %c0_i32 = arith.constant 0 : i32
    %c0_i32_0 = arith.constant 0 : i32
    %c0_i32_1 = arith.constant 0 : i32
    return %c0_i32, %c0_i32_0 : i32, i32
  }
  func.func @transform_1(%arg0: i32) -> (i32, i32) {
    %c0_i32 = arith.constant 0 : i32
    %c0_i32_0 = arith.constant 0 : i32
    %c0_i32_1 = arith.constant 0 : i32
    return %c0_i32, %c0_i32_0 : i32, i32
  }
  func.func @transform_2(%arg0: i32) -> (i32, i32) {
    %c0_i32 = arith.constant 0 : i32
    %c0_i32_0 = arith.constant 0 : i32
    %c0_i32_1 = arith.constant 0 : i32
    return %c0_i32, %c0_i32_0 : i32, i32
  }
  func.func @transform_3(%arg0: i32) -> (i32, i32) {
    %c0_i32 = arith.constant 0 : i32
    %c0_i32_0 = arith.constant 0 : i32
    %c0_i32_1 = arith.constant 0 : i32
    return %c0_i32, %c0_i32_0 : i32, i32
  }
  func.func @transform_4(%arg0: i32) -> (i32, i32) {
    %c0_i32 = arith.constant 0 : i32
    %c0_i32_0 = arith.constant 0 : i32
    %c0_i32_1 = arith.constant 0 : i32
    return %c0_i32, %c0_i32_0 : i32, i32
  }
  func.func @transform_5(%arg0: i32) -> (i32, i32) {
    %c0_i32 = arith.constant 0 : i32
    %c0_i32_0 = arith.constant 0 : i32
    %c0_i32_1 = arith.constant 0 : i32
    return %c0_i32, %c0_i32_0 : i32, i32
  }
}

</mosaic_0001>

<bundles_post_ra>
// kernel: tpu_custom_call.1
= control target key start
LH: loop header
LB: loop body
LE: loop exit
PB: predicated region body
PF: predicated region fallthrough
CT: control target
= control target key end

     0   :  { %v521_v3 = vmov 0.0|0.0   ;;  %vm522_vm0 = vmmov 0   ;;  %v523_v6 = vmov 0.0   ;;  %s651_s0 = inlined_call_operand.vmem [shape: f32[8,32], index: 0, kind: input, shape index: {}]   ;;  %s652_s1 = inlined_call_operand.vmem [shape: f32[32,64], index: 1, kind: input, shape index: {}]   ;;  %s653_s2 = inlined_call_operand.vmem [shape: f32[1,64], index: 2, kind: input, shape index: {}]   ;;  %s654_s3 = inlined_call_operand.vmem [shape: f32[64,16], index: 3, kind: input, shape index: {}]   ;;  %s655_s4 = inlined_call_operand.vmem [shape: f32[1,16], index: 4, kind: input, shape index: {}]   ;;  %s656_s5 = inlined_call_operand.hbm [shape: f32[8,128], index: 5, kind: output, shape index: {}]  }
   0x1   :  { %v22_v0 = vld [vmem:[%s652_s1] sm:$0xff]  ;;  %v23_v1 = vld [vmem:[%s652_s1 + $0x8] sm:$0xff]  ;;  %v24_v2 = vld [vmem:[%s652_s1 + $0x10] sm:$0xff]  ;;  %456 = vmatprep.subr.bf16.mxu0 %v521_v3  ;;  %425 = vmatprep.mubr.msk.f32.mxu0 %vm522_vm0, %v523_v6 }
   0x2   :  { %v457_v4 = vpack.c.bf16 %v23_v1, %v22_v0  ;;  %v25_v5 = vld [vmem:[%s652_s1 + $0x18] sm:$0xff]  ;;  %v148_v7 = vld [vmem:[%s654_s3] sm:$0xff]  ;;  %v149_v8 = vld [vmem:[%s654_s3 + $0x8] sm:$0xff] }
   0x3   :  { %v150_v9 = vld [vmem:[%s654_s3 + $0x10] sm:$0xff]  ;;  %v151_v10 = vld [vmem:[%s654_s3 + $0x18] sm:$0xff]  ;;  %v460_v11 = vpack.c.bf16 %v25_v5, %v24_v2  ;;  %v462_v12 = vpack.c.bf16 %v149_v8, %v148_v7 }
   0x4   :  { %458 = vmatpush3.bf16.msra.mxu0 %v457_v4 }
   0x5   :  { %10 = vsyncpa [#allocation3], 0  ;;  %459 = vmatprep.subr.bf16.mxu0 %v521_v3  ;;  %v466_v13 = vpack.c.bf16 %v151_v10, %v150_v9  ;;  %478 = vmatprep.subr.bf16.mxu1 %v462_v12  ;;  %v21_v14 = vld [vmem:[%s651_s0] sm:$0xff]  ;;  %vm33_vm1 = vcmask 261120   ;;  %v153_v16 = vld [vmem:[%s654_s3 + $0x28] sm:$0xff]  ;;  %vm163_vm2 = vcmask 523264  }
   0x6   :  { %482 = vmatpush3.bf16.msra.mxu1 %v462_v12  ;;  %v152_v15 = vld [vmem:[%s654_s3 + $0x20] sm:$0xff]  ;;  %v154_v18 = vld [vmem:[%s654_s3 + $0x30] sm:$0xff]  ;;  %v155_v19 = vld [vmem:[%s654_s3 + $0x38] sm:$0xff]  ;;  %s524_s19 = smov 16   ;;  %s526_s20 = smov 48  }
   0x7   :  { %479 = vmatprep.subr.bf16.mxu1 %v466_v13  ;;  %v470_v17 = vpack.c.bf16 %v153_v16, %v152_v15  ;;  %v474_v20 = vpack.c.bf16 %v155_v19, %v154_v18  ;;  %v385_v21 = vld [vmem:[%s653_s2] ss:$0 sm:$0xff]  ;;  %s527_s21 = smov 64   ;;  %s528_s22 = smov 80  }
   0x8   :  { %461 = vmatpush3.bf16.msra.mxu0 %v460_v11  ;;  %v387_v54 = vld [vmem:[%s655_s4] ss:$0 sm:$0xff]  ;;  %s525_s4 = smov 32   ;;  %s529_s23 = smov 96  }
   0x9   :  { %463 = vmatprep.subr.bf16.mxu0 %v462_v12  ;;  %s530_s24 = smov 112   ;;  %s531_s25 = smov [#allocation2]  }
   0xa   :  { %483 = vmatpush3.bf16.msra.mxu1 %v466_v13  ;;  %s377_s26 = sshll.u32 %s531_s25, 4  ;;  %s378_s26 = int_to_ptr.vmem [resolvable:$true] %s377_s26 }
   0xb   :  { %426 = vmatmul.mubr.msk.f32.vlgmr.msra.gmra.mrb[0].mxu0 %vm33_vm1, %v21_v14  ;;  %480 = vmatprep.subr.bf16.mxu1 %v470_v17  ;;  %s497_s27 = scalar_lea.vmem %s378_s26, 128  ;;  %p502_p1 = scmp.lt.s32.totalorder %s378_s26, %s378_s26 }
   0xc   :  { %465 = vmatpush3.bf16.msra.mxu0 %v462_v12  ;;  %p498_p0 = scmp.ne.s32.totalorder %s378_s26, %s497_s27  ;;  %p503_p2 = scmp.lt.s32.totalorder %s497_s27, %s497_s27 }
   0xd   :  { %467 = vmatprep.subr.bf16.mxu0 %v466_v13 }
   0xe   :  { %484 = vmatpush3.bf16.msra.mxu1 %v470_v17  ;;  %p504_p3 = por %p503_p2, %p502_p1 }
   0xf   :  { %481 = vmatprep.subr.bf16.mxu1 %v474_v20 }
  0x10   :  { %469 = vmatpush3.bf16.msra.mxu0 %v466_v13  ;;  %p505_p4 = pnand %p504_p3, %p498_p0 }
  0x11   :  { %471 = vmatprep.subr.bf16.mxu0 %v470_v17 }
  0x12   :  { %485 = vmatpush3.bf16.msra.mxu1 %v474_v20 }
  0x14   :  { %473 = vmatpush3.bf16.msra.mxu0 %v470_v17 }
  0x15   :  { %475 = vmatprep.subr.bf16.mxu0 %v474_v20 }
  0x18   :  { %477 = vmatpush3.bf16.msra.mxu0 %v474_v20 }
  0xde   :  { %v103_v22 = vpop.f32.mrb[0].mxu0 }
  0xdf   :  { %v104_v23 = vadd.f32 %v385_v21, %v103_v22  ;;  %v427_v24 = vpop.f32.mrb[1].mxu0 }
  0xe1   :  { %vm111_vm3 = vcmp.gt.f32.partialorder %v104_v23, 1.0  ;;  %v113_v25 = vmul.f32 0.95, %v104_v23 }
  0xe2   :  { %v112_v26 = vsel %vm111_vm3, 1.0, %v523_v6 }
  0xe3   :  { %v114_v27 = vadd.f32 %v113_v25, %v104_v23  ;;  %444 = vmatprep.mubr.msk.f32.mxu0 %vm163_vm2, %v112_v26 }
  0xe5   :  { %v115_v28 = vsub.f32 %v114_v27, %v112_v26 }
  0xe7   :  { %vm116_vm4 = vcmp.gt.f32.partialorder %v115_v28, 1.0  ;;  %v118_v29 = vmul.f32 0.95, %v115_v28 }
  0xe8   :  { %v117_v30 = vsel %vm116_vm4, 1.0, %v523_v6  ;;  %vm358_vm4 = vcmask 130048  }
  0xe9   :  { %445 = vmatmul.mubr.msk.f32.vlgmr.msra.gmra.mrb[2].mxu0 %vm163_vm2, %v117_v30  ;;  %v119_v31 = vadd.f32 %v118_v29, %v104_v23 }
  0xeb   :  { %v120_v32 = vsub.f32 %v119_v31, %v117_v30 }
  0xed   :  { %vm121_vm5 = vcmp.gt.f32.partialorder %v120_v32, 1.0  ;;  %v123_v33 = vmul.f32 0.95, %v120_v32 }
  0xee   :  { %v122_v34 = vsel %vm121_vm5, 1.0, %v523_v6  ;;  %vm361_vm5 = vcmask 392192  }
  0xef   :  { %v124_v35 = vadd.f32 %v123_v33, %v104_v23  ;;  %447 = vmatprep.mubr.msk.f32.mxu1 %vm163_vm2, %v122_v34 }
  0xf1   :  { %v125_v36 = vsub.f32 %v124_v35, %v122_v34 }
  0xf3   :  { %vm126_vm6 = vcmp.gt.f32.partialorder %v125_v36, 1.0  ;;  %v128_v37 = vmul.f32 0.95, %v125_v36 }
  0xf4   :  { %v127_v38 = vsel %vm126_vm6, 1.0, %v523_v6  ;;  %vm364_vm6 = vcmask 654336  }
  0xf5   :  { %v129_v39 = vadd.f32 %v128_v37, %v104_v23  ;;  %448 = vmatmul.mubr.msk.f32.vlgmr.msra.gmra.mrb[0].mxu1 %vm163_vm2, %v127_v38 }
  0xf7   :  { %v130_v40 = vsub.f32 %v129_v39, %v127_v38 }
  0xf9   :  { %v133_v41 = vmul.f32 0.95, %v130_v40  ;;  %vm131_vm7 = vcmp.gt.f32.partialorder %v130_v40, 1.0 }
  0xfa   :  { %v132_v42 = vsel %vm131_vm7, 1.0, %v523_v6  ;;  %vm366_vm7 = vcmask 785408  }
  0xfb   :  { %v134_v43 = vadd.f32 %v133_v41, %v104_v23  ;;  %450 = vmatprep.mubr.msk.f32.mxu1 %vm163_vm2, %v132_v42 }
  0xfd   :  { %v135_v44 = vsub.f32 %v134_v43, %v132_v42 }
  0xff   :  { %v138_v45 = vmul.f32 0.95, %v135_v44  ;;  %vm136_vm8 = vcmp.gt.f32.partialorder %v135_v44, 1.0 }
 0x100   :  { %v137_v46 = vsel %vm136_vm8, 1.0, %v523_v6  ;;  %vm368_vm8 = vcmask 916480  }
 0x101   :  { %v139_v47 = vadd.f32 %v138_v45, %v104_v23  ;;  %451 = vmatmul.mubr.msk.f32.gmra.mrb[2].mxu1 %vm163_vm2, %v137_v46 }
 0x103   :  { %v140_v48 = vsub.f32 %v139_v47, %v137_v46 }
 0x105   :  { %v143_v49 = vmul.f32 0.95, %v140_v48  ;;  %vm141_vm9 = vcmp.gt.f32.partialorder %v140_v48, 1.0 }
 0x106   :  { %v142_v50 = vsel %vm141_vm9, 1.0, %v523_v6 }
 0x107   :  { %v144_v51 = vadd.f32 %v143_v49, %v104_v23  ;;  %453 = vmatprep.mubr.msk.f32.mxu1 %vm163_vm2, %v142_v50 }
 0x109   :  { %v145_v52 = vsub.f32 %v144_v51, %v142_v50 }
 0x10b   :  { %vm146_vm10 = vcmp.gt.f32.partialorder %v145_v52, 1.0 }
 0x10c   :  { %v147_v53 = vsel %vm146_vm10, 1.0, %v523_v6 }
 0x10d   :  { %454 = vmatmul.mubr.msk.f32.gmra.mrb[4].mxu1 %vm163_vm2, %v147_v53 }
 0x1bc   :  { %v446_v55 = vpop.f32.mrb[2].mxu0 }
 0x1bd   :  { %v254_v56 = vpop.f32.mrb[3].mxu0  ;;  %v260_v58 = vadd.f32 %v446_v55, %v387_v54 }
 0x1be   :  { %v625_v57 = vadd.f32 %v387_v54, %v254_v56 }
 0x1c0   :  { %v295_v59 = vmul.f32 0.95, %v625_v57  ;;  %vm297_vm11 = vcmp.gt.f32.partialorder %v625_v57, 1.0 }
 0x1c1   :  { %v298_v61 = vsel %vm297_vm11, 1.0, %v523_v6 }
 0x1c2   :  { %v296_v60 = vadd.f32 %v295_v59, %v260_v58 }
 0x1c4   :  { %v299_v62 = vsub.f32 %v296_v60, %v298_v61 }
 0x1c6   :  { %331 = vrot.lane.b32.xlu0 %v299_v62, %s524_s19  ;;  %v300_v2 = vmul.f32 0.95, %v299_v62  ;;  %vm302_vm12 = vcmp.gt.f32.partialorder %v299_v62, 1.0 }
 0x1c7   :  { %v303_v4 = vsel %vm302_vm12, 1.0, %v523_v6 }
 0x1c8   :  { %v449_v63 = vpop.f32.mrb[0].mxu1 }
 0x1c9   :  { %v264_v0 = vpop.f32.mrb[1].mxu1  ;;  %v270_v7 = vadd.f32 %v449_v63, %v387_v54 }
 0x1ca   :  { %v265_v1 = vadd.f32 %v387_v54, %v264_v0 }
 0x1cc   :  { %v301_v3 = vadd.f32 %v300_v2, %v265_v1 }
 0x1ce   :  { %v304_v5 = vsub.f32 %v301_v3, %v303_v4 }
 0x1d0   :  { %335 = vrot.lane.b32.xlu0 %v304_v5, %s525_s4  ;;  %v305_v8 = vmul.f32 0.95, %v304_v5  ;;  %vm307_vm13 = vcmp.gt.f32.partialorder %v304_v5, 1.0 }
 0x1d1   :  { %v308_v10 = vsel %vm307_vm13, 1.0, %v523_v6 }
 0x1d2   :  { %v306_v9 = vadd.f32 %v305_v8, %v270_v7 }
 0x1d4   :  { %v452_v11 = vpop.f32.mrb[2].mxu1  ;;  %v309_v12 = vsub.f32 %v306_v9, %v308_v10 }
 0x1d5   :  { %v274_v13 = vpop.f32.mrb[3].mxu1  ;;  %v280_v19 = vadd.f32 %v452_v11, %v387_v54 }
 0x1d6   :  { %v275_v14 = vadd.f32 %v387_v54, %v274_v13  ;;  %v310_v15 = vmul.f32 0.95, %v309_v12  ;;  %339 = vrot.lane.b32.xlu1 %v309_v12, %s526_s20  ;;  %vm312_vm14 = vcmp.gt.f32.partialorder %v309_v12, 1.0 }
 0x1d7   :  { %v313_v17 = vsel %vm312_vm14, 1.0, %v523_v6 }
 0x1d8   :  { %v311_v16 = vadd.f32 %v310_v15, %v275_v14 }
 0x1da   :  { %v314_v18 = vsub.f32 %v311_v16, %v313_v17 }
 0x1dc   :  { %343 = vrot.lane.b32.xlu1 %v314_v18, %s527_s21  ;;  %v315_v20 = vmul.f32 0.95, %v314_v18  ;;  %vm317_vm15 = vcmp.gt.f32.partialorder %v314_v18, 1.0 }
 0x1dd   :  { %v318_v22 = vsel %vm317_vm15, 1.0, %v523_v6 }
 0x1de   :  { %v316_v21 = vadd.f32 %v315_v20, %v280_v19 }
 0x1e0   :  { %v455_v23 = vpop.f32.mrb[4].mxu1  ;;  %v319_v24 = vsub.f32 %v316_v21, %v318_v22 }
 0x1e1   :  { %v284_v25 = vpop.f32.mrb[5].mxu1  ;;  %v290_v31 = vadd.f32 %v455_v23, %v387_v54 }
 0x1e2   :  { %v285_v26 = vadd.f32 %v387_v54, %v284_v25  ;;  %v320_v27 = vmul.f32 0.95, %v319_v24  ;;  %347 = vrot.lane.b32.xlu0 %v319_v24, %s528_s22  ;;  %vm322_vm0 = vcmp.gt.f32.partialorder %v319_v24, 1.0 }
 0x1e3   :  { %v323_v29 = vsel %vm322_vm0, 1.0, %v523_v6 }
 0x1e4   :  { %v321_v28 = vadd.f32 %v320_v27, %v285_v26 }
 0x1e6   :  { %v324_v30 = vsub.f32 %v321_v28, %v323_v29 }
 0x1e8   :  { %351 = vrot.lane.b32.xlu1 %v324_v30, %s529_s23  ;;  %v325_v32 = vmul.f32 0.95, %v324_v30  ;;  %vm327_vm3 = vcmp.gt.f32.partialorder %v324_v30, 1.0 }
 0x1e9   :  { %v328_v34 = vsel %vm327_vm3, 1.0, %v523_v6 }
 0x1ea   :  { %v326_v33 = vadd.f32 %v325_v32, %v290_v31 }
 0x1ec   :  { %v329_v35 = vsub.f32 %v326_v33, %v328_v34 }
 0x1ee   :  { %355 = vrot.lane.b32.xlu0 %v329_v35, %s530_s24 }
 0x238   :  { %v332_v36 = vpop.permute.xlu0 %331 }
 0x239   :  { %v359_v40 = vsel %vm358_vm4, %v625_v57, %v332_v36 }
 0x242   :  { %v336_v38 = vpop.permute.xlu0 %335 }
 0x243   :  { %v360_v41 = vsel %vm33_vm1, %v359_v40, %v336_v38 }
 0x248   :  { %v340_v37 = vpop.permute.xlu1 %339 }
 0x249   :  { %v362_v43 = vsel %vm361_vm5, %v360_v41, %v340_v37 }
 0x24e   :  { %v344_v39 = vpop.permute.xlu1 %343 }
 0x24f   :  { %v363_v6 = vsel %vm163_vm2, %v362_v43, %v344_v39 }
 0x254   :  { %v348_v42 = vpop.permute.xlu0 %347 }
 0x255   :  { %v365_v45 = vsel %vm364_vm6, %v363_v6, %v348_v42 }
 0x25a   :  { %v352_v44 = vpop.permute.xlu1 %351 }
 0x25b   :  { %v367_v46 = vsel %vm366_vm7, %v365_v45, %v352_v44 }
 0x260   :  { %v356_v47 = vpop.permute.xlu0 %355 }
 0x261   :  { %v369_v48 = vsel %vm368_vm8, %v367_v46, %v356_v47 }
 0x262   :  { %370 = vst [vmem:[#allocation2] sm:$0xff] %v369_v48 }
 0x263   :  { %508 = shalt.err (!%p505_p4)
}
 0x264   :  { %s509_s30 = scalar_lea.hbm %s656_s5, 128 }
 0x265   :  { %p510_p5 = scmp.ne.s32.totalorder %s656_s5, %s509_s30  ;;  %p513_p6 = scmp.lt.u32.totalorder %s509_s30, %s656_s5 }
 0x267   :  { %p515_p7 = pnand %p513_p6, %p510_p5 }
 0x269   :  { %518 = shalt.err (!%p515_p7)
}
 0x26a   :  { %380 = dma.vmem_to_hbm [thread:$0]  %s378_s26, 128, %s656_s5, [#allocation3]  }
 0x26b   :  { %519 = dma.done.wait [#allocation3], 128  }
 0x26c   :  { %520 = vsyncadd [#allocation3], 4294967168 }
 0x26d   :  { %384 = vsyncpa [#allocation3], 1 }

</bundles_post_ra>
